<compile_context>
chip_gen: v7x
topology: tpu7x:2x2x1
jax: 0.10.0
libtpu: 0.0.40
codegen_flags: <defaults>
</compile_context>

<pallas_src>
import jax
import jax.numpy as jnp
from jax.experimental import pallas as pl
from jax.experimental.pallas import tpu as pltpu


def _pooling_block_kernel(t_ref, w3_ref, w1_ref, o_ref):
    # t_ref  : (1, K, Pt)    shared conv/pool taps (+ ones row), K = D*D*Cin + 1
    # w3_ref : (Cout, K)     3x3 conv weights over the D*D taps, bias column last
    # w1_ref : (Cout, K)     1x1 conv weights tiled over the s*s pool taps
    #                        (pre-scaled by 1/s^2), zeros elsewhere, bias last
    # o_ref  : (1, Cout, Pt) lane-dense output (spatial extent on lanes)
    taps = t_ref[0]
    out1 = jnp.maximum(
        jnp.dot(w3_ref[...], taps, preferred_element_type=jnp.float32), 0.0)
    out2 = jnp.maximum(
        jnp.dot(w1_ref[...], taps, preferred_element_type=jnp.float32), 0.0)
    o_ref[0] = (out1 + out2).astype(o_ref.dtype)


def _vmem_config():
    """Generation-aware VMEM budget (v5e/v6e: 128 MiB physical, v7x: 64 MiB)."""
    cap = 64 * 1024 * 1024
    try:
        cap = int(getattr(pltpu.get_tpu_info(), "vmem_capacity_bytes", cap))
    except Exception:
        pass
    budget = max(int(cap * 0.45), 24 * 1024 * 1024)
    limit = max(int(cap * 0.75), 40 * 1024 * 1024)
    return budget, limit


def _choose_lane_tile(l_pad, k, cout, tap_bytes, out_bytes, w_bytes, budget):
    """Largest lane tile whose double-buffered blocks (incl. both weight
    matrices) fit the VMEM budget; prefers >= 512 lanes for DMA efficiency."""
    fixed = 2 * 2 * cout * k * w_bytes                 # 2 weight mats, dbl-buffered
    per_lane = 2 * (k * tap_bytes + cout * out_bytes)  # taps + output, dbl-buffered
    cands = sorted({c for c in (l_pad, 2048, 1024, 512, 256, 128) if c <= l_pad},
                   reverse=True)
    for t in cands:
        if l_pad % t == 0 and fixed + t * per_lane <= budget:
            return t
    return 128


def pooling_block(x_nchw, w3, b3, w1, b1, stride, compute_dtype=jnp.bfloat16):
    """x_nchw: [N, Cin, H, W]; w3: [Cout, Cin, 3, 3]; b3: [Cout];
    w1: [Cout, Cin, 1, 1]; b1: [Cout]. Returns [N, Cout, H//s, W//s] (NCHW)."""
    N, Cin, H, W = x_nchw.shape
    Cout = w3.shape[0]
    s = int(stride)
    assert H % s == 0 and W % s == 0, "spatial dims must be divisible by stride"
    Ho, Wo = H // s, W // s
    P = Ho * Wo
    D = max(3, s + 1)            # union of the 3x3 conv taps and s x s pool taps
    K0 = D * D * Cin
    K = K0 + 1                   # + ones row carrying the biases

    out_dtype = x_nchw.dtype
    tap_bytes = jnp.dtype(compute_dtype).itemsize
    out_bytes = jnp.dtype(out_dtype).itemsize

    # ---- tap extraction (wrapper-side layout glue, plain JAX) ----
    # TODO(synk): build these in-kernel from a halo'd x block (strided lane
    # slicing) to remove the im2row HBM materialization / read amplification.
    xp = jnp.pad(x_nchw, ((0, 0), (0, 0), (1, 1), (1, 1)))          # zero pad=1
    tap_list = []
    for dh in range(D):
        for dw in range(D):
            tap_list.append(xp[:, :, dh:dh + s * (Ho - 1) + 1:s,
                                     dw:dw + s * (Wo - 1) + 1:s])   # [N,Cin,Ho,Wo]
    stacked = jnp.stack(tap_list, axis=0)                           # [T,N,Cin,Ho,Wo]

    fold_batch = P < 512         # small images: fold N into the lane axis
    if fold_batch:
        n_eff, l_eff = 1, N * P
        taps = jnp.transpose(stacked, (0, 2, 1, 3, 4)).reshape(1, K0, l_eff)
    else:
        n_eff, l_eff = N, P
        taps = jnp.transpose(stacked, (1, 0, 2, 3, 4)).reshape(N, K0, l_eff)

    l_pad = ((l_eff + 127) // 128) * 128             # lane-dense stores
    if l_pad != l_eff:
        taps = jnp.pad(taps, ((0, 0), (0, 0), (0, l_pad - l_eff)))
    taps = jnp.concatenate(
        [taps, jnp.ones((n_eff, 1, l_pad), taps.dtype)], axis=1)    # bias row
    taps = taps.astype(compute_dtype)

    # ---- weights: expand over the D*D taps, fold AvgPool scale & biases ----
    w3_box = jnp.transpose(w3, (0, 2, 3, 1))                        # [Cout,3,3,Cin]
    if D > 3:
        w3_box = jnp.pad(w3_box, ((0, 0), (0, D - 3), (0, D - 3), (0, 0)))
    w3_flat = w3_box.reshape(Cout, K0)
    w1_2d = w1.reshape(Cout, Cin)
    w1_box = jnp.zeros((Cout, D, D, Cin), w1.dtype).at[:, 1:s + 1, 1:s + 1, :].set(
        w1_2d[:, None, None, :] / float(s * s))
    w1_flat = w1_box.reshape(Cout, K0)
    w3_aug = jnp.concatenate([w3_flat, b3.reshape(Cout, 1)],
                             axis=1).astype(compute_dtype)
    w1_aug = jnp.concatenate([w1_flat, b1.reshape(Cout, 1)],
                             axis=1).astype(compute_dtype)

    # ---- tiling / VMEM budgeting ----
    budget, vmem_limit = _vmem_config()
    Pt = _choose_lane_tile(l_pad, K, Cout, tap_bytes, out_bytes, tap_bytes, budget)
    grid = (n_eff, l_pad // Pt)

    out = pl.pallas_call(
        _pooling_block_kernel,
        out_shape=jax.ShapeDtypeStruct((n_eff, Cout, l_pad), out_dtype),
        grid=grid,
        in_specs=[
            pl.BlockSpec((1, K, Pt), lambda n, p: (n, 0, p)),
            # grid-constant weight blocks
            # TODO(synk): single-buffer these (pipeline_mode=pl.Buffered(1)).
            pl.BlockSpec((Cout, K), lambda n, p: (0, 0)),
            pl.BlockSpec((Cout, K), lambda n, p: (0, 0)),
        ],
        out_specs=pl.BlockSpec((1, Cout, Pt), lambda n, p: (n, 0, p)),
        compiler_params=pltpu.CompilerParams(
            dimension_semantics=("parallel", "parallel"),
            vmem_limit_bytes=vmem_limit),
    )(taps, w3_aug, w1_aug)

    if fold_batch:
        out = out[0, :, :N * P].reshape(Cout, N, Ho, Wo).transpose(1, 0, 2, 3)
    else:
        out = out[:, :, :P].reshape(N, Cout, Ho, Wo)
    return out


def _reference(x, w3, b3, w1, b1, s):
    """Pure-JAX reference matching the PyTorch module (NCHW, f32)."""
    out1 = jax.lax.conv_general_dilated(
        x, w3, window_strides=(s, s), padding=((1, 1), (1, 1)),
        dimension_numbers=("NCHW", "OIHW", "NCHW"))
    out1 = jax.nn.relu(out1 + b3.reshape(1, -1, 1, 1))
    pooled = jax.lax.reduce_window(
        x, 0.0, jax.lax.add, (1, 1, s, s), (1, 1, s, s), "VALID") / float(s * s)
    out2 = jax.lax.conv_general_dilated(
        pooled, w1, window_strides=(1, 1), padding="VALID",
        dimension_numbers=("NCHW", "OIHW", "NCHW"))
    out2 = jax.nn.relu(out2 + b1.reshape(1, -1, 1, 1))
    return out1 + out2


if __name__ == "__main__":
    # Pooling_Block(in_channel=4, out_channel=8, stride=2), input [2, 4, 16, 16]
    N, Cin, Cout, H, W, stride = 2, 4, 8, 16, 16, 2

    key = jax.random.PRNGKey(0)
    kx, kw3, kb3, kw1, kb1 = jax.random.split(key, 5)
    x = jax.random.normal(kx, (N, Cin, H, W), jnp.float32)
    w3 = jax.random.normal(kw3, (Cout, Cin, 3, 3), jnp.float32) * 0.1
    b3 = jax.random.normal(kb3, (Cout,), jnp.float32) * 0.1
    w1 = jax.random.normal(kw1, (Cout, Cin, 1, 1), jnp.float32) * 0.1
    b1 = jax.random.normal(kb1, (Cout,), jnp.float32) * 0.1

    ref = jax.block_until_ready(_reference(x, w3, b3, w1, b1, stride))

    # f32 path: exact layout / indexing / bias-fold check (tight tolerance)
    out_f32 = jax.block_until_ready(
        pooling_block(x, w3, b3, w1, b1, stride, compute_dtype=jnp.float32))
    assert out_f32.shape == (N, Cout, H // stride, W // stride), out_f32.shape
    assert jnp.allclose(out_f32, ref, atol=1e-4, rtol=1e-4), float(
        jnp.max(jnp.abs(out_f32 - ref)))

    # bf16 path (production default): looser tolerance for bf16 tap/weight cast
    out_bf16 = jax.block_until_ready(pooling_block(x, w3, b3, w1, b1, stride))
    assert out_bf16.shape == (N, Cout, H // stride, W // stride), out_bf16.shape
    assert jnp.allclose(out_bf16, ref, atol=5e-2, rtol=5e-2), float(
        jnp.max(jnp.abs(out_bf16 - ref)))

    # larger spatial extent exercises the non-batch-folded (P >= 512) path
    x2 = jax.random.normal(kx, (1, Cin, 64, 64), jnp.float32)
    out2 = jax.block_until_ready(pooling_block(x2, w3, b3, w1, b1, stride))
    ref2 = jax.block_until_ready(_reference(x2, w3, b3, w1, b1, stride))
    assert jnp.allclose(out2, ref2, atol=5e-2, rtol=5e-2), float(
        jnp.max(jnp.abs(out2 - ref2)))

    print("KERNEL_OK")
</pallas_src>

<mosaic_0001>
module attributes {stable_mosaic.version = 11 : i64} {
  func.func @_pooling_block_kernel(%arg0: i32, %arg1: i32, %arg2: memref<1x37x128xf32, #tpu.memory_space<vmem>>, %arg3: memref<8x37xf32, #tpu.memory_space<vmem>>, %arg4: memref<8x37xf32, #tpu.memory_space<vmem>>, %arg5: memref<1x8x128xf32, #tpu.memory_space<vmem>>) attributes {dimension_semantics = [#tpu.dimension_semantics<parallel>, #tpu.dimension_semantics<parallel>], iteration_bounds = array<i64: 1, 1>, scalar_prefetch = 0 : i64, scratch_operands = 0 : i64, tpu.core_type = #tpu.core_type<tc>, window_params = [{transform_indices = @transform_0, window_bounds = array<i64: 1, 37, 128>}, {pipeline_mode = #tpu.pipeline_mode<synchronous>, transform_indices = @transform_1, window_bounds = array<i64: 8, 37>}, {pipeline_mode = #tpu.pipeline_mode<synchronous>, transform_indices = @transform_2, window_bounds = array<i64: 8, 37>}, {transform_indices = @transform_3, window_bounds = array<i64: 1, 8, 128>}]} {
    %c0 = arith.constant 0 : index
    %c0_0 = arith.constant 0 : index
    %c0_1 = arith.constant 0 : index
    %0 = vector.load %arg2[%c0, %c0_0, %c0_1] : memref<1x37x128xf32, #tpu.memory_space<vmem>>, vector<1x37x128xf32>
    %1 = vector.shape_cast %0 : vector<1x37x128xf32> to vector<37x128xf32>
    %c0_2 = arith.constant 0 : index
    %c0_3 = arith.constant 0 : index
    %2 = vector.load %arg3[%c0_2, %c0_3] : memref<8x37xf32, #tpu.memory_space<vmem>>, vector<8x37xf32>
    %cst = arith.constant dense<0.000000e+00> : vector<8x128xf32>
    %3 = tpu.matmul %2, %1, %cst {dimension_numbers = #tpu.dot_dimension_numbers<[1], [0], [0], [1], [0, 0, 1, 1], [], []>} : vector<8x37xf32>, vector<37x128xf32>, vector<8x128xf32> -> vector<8x128xf32>
    %cst_4 = arith.constant 0.000000e+00 : f32
    %4 = vector.broadcast %cst_4 : f32 to vector<8x128xf32>
    %5 = arith.maximumf %3, %4 : vector<8x128xf32>
    %c0_5 = arith.constant 0 : index
    %c0_6 = arith.constant 0 : index
    %6 = vector.load %arg4[%c0_5, %c0_6] : memref<8x37xf32, #tpu.memory_space<vmem>>, vector<8x37xf32>
    %cst_7 = arith.constant dense<0.000000e+00> : vector<8x128xf32>
    %7 = tpu.matmul %6, %1, %cst_7 {dimension_numbers = #tpu.dot_dimension_numbers<[1], [0], [0], [1], [0, 0, 1, 1], [], []>} : vector<8x37xf32>, vector<37x128xf32>, vector<8x128xf32> -> vector<8x128xf32>
    %cst_8 = arith.constant 0.000000e+00 : f32
    %8 = vector.broadcast %cst_8 : f32 to vector<8x128xf32>
    %9 = arith.maximumf %7, %8 : vector<8x128xf32>
    %10 = arith.addf %5, %9 : vector<8x128xf32>
    %c0_9 = arith.constant 0 : index
    %c0_10 = arith.constant 0 : index
    %c0_11 = arith.constant 0 : index
    %11 = vector.load %arg5[%c0_9, %c0_10, %c0_11] : memref<1x8x128xf32, #tpu.memory_space<vmem>>, vector<1x8x128xf32>
    %12 = vector.shape_cast %11 : vector<1x8x128xf32> to vector<8x128xf32>
    %13 = vector.shape_cast %10 : vector<8x128xf32> to vector<1x8x128xf32>
    tpu.vector_store %arg5[%c0_9, %c0_10, %c0_11], %13 {strides = array<i32>} : memref<1x8x128xf32, #tpu.memory_space<vmem>>, vector<1x8x128xf32>,
    return
  }
  func.func @transform_0(%arg0: i32, %arg1: i32) -> (i32, i32, i32) {
    %c0_i32 = arith.constant 0 : i32
    %c0_i32_0 = arith.constant 0 : i32
    return %arg0, %c0_i32, %arg1 : i32, i32, i32
  }
  func.func @transform_1(%arg0: i32, %arg1: i32) -> (i32, i32) {
    %c0_i32 = arith.constant 0 : i32
    %c0_i32_0 = arith.constant 0 : i32
    %c0_i32_1 = arith.constant 0 : i32
    return %c0_i32, %c0_i32_0 : i32, i32
  }
  func.func @transform_2(%arg0: i32, %arg1: i32) -> (i32, i32) {
    %c0_i32 = arith.constant 0 : i32
    %c0_i32_0 = arith.constant 0 : i32
    %c0_i32_1 = arith.constant 0 : i32
    return %c0_i32, %c0_i32_0 : i32, i32
  }
  func.func @transform_3(%arg0: i32, %arg1: i32) -> (i32, i32, i32) {
    %c0_i32 = arith.constant 0 : i32
    %c0_i32_0 = arith.constant 0 : i32
    return %arg0, %c0_i32, %arg1 : i32, i32, i32
  }
}

</mosaic_0001>

<bundles_post_ra>
// kernel: tpu_custom_call.1
= control target key start
LH: loop header
LB: loop body
LE: loop exit
PB: predicated region body
PF: predicated region fallthrough
CT: control target
= control target key end

     0   :  { %v273_v3 = vmov 0.0|0.0   ;;  %vm274_vm0 = vmmov 0   ;;  %v275_v6 = vmov 0.0   ;;  %s330_s0 = inlined_call_operand.vmem [shape: f32[1,37,128], index: 0, kind: input, shape index: {}]   ;;  %s331_s1 = inlined_call_operand.vmem [shape: f32[8,37], index: 1, kind: input, shape index: {}]   ;;  %s332_s2 = inlined_call_operand.vmem [shape: f32[8,37], index: 2, kind: input, shape index: {}]   ;;  %s333_s3 = inlined_call_operand.hbm [shape: f32[1,8,128], index: 3, kind: output, shape index: {}]  }
   0x1   :  { %v15_v0 = vld [vmem:[%s330_s0] sm:$0xff]  ;;  %v16_v1 = vld [vmem:[%s330_s0 + $0x8] sm:$0xff]  ;;  %v17_v2 = vld [vmem:[%s330_s0 + $0x10] sm:$0xff]  ;;  %233 = vmatprep.subr.bf16.mxu0 %v273_v3  ;;  %239 = vmatprep.subr.bf16.mxu1 %v273_v3 }
   0x2   :  { %v234_v4 = vpack.c.bf16 %v16_v1, %v15_v0  ;;  %v18_v5 = vld [vmem:[%s330_s0 + $0x18] sm:$0xff]  ;;  %217 = vmatprep.mubr.msk.f32.mxu0 %vm274_vm0, %v275_v6  ;;  %230 = vmatprep.mubr.msk.f32.mxu1 %vm274_vm0, %v275_v6 }
   0x3   :  { %8 = vsyncpa [#allocation3], 0  ;;  %v237_v7 = vpack.c.bf16 %v18_v5, %v17_v2  ;;  %v19_v8 = vld [vmem:[%s330_s0 + $0x20] sm:$0x1f]  ;;  %vm25_vm1 = vcmask 1044480   ;;  %vm21_vm2 = vcmask 302080  }
   0x4   :  { %235 = vmatpush3.bf16.msra.mxu0 %v234_v4  ;;  %241 = vmatpush3.bf16.msra.mxu1 %v234_v4  ;;  %v20_v9 = vld [vmem:[%s331_s1] sm:$0xff]  ;;  %s276_s26 = smov [#allocation2]  }
   0x5   :  { %236 = vmatprep.subr.bf16.mxu0 %v273_v3  ;;  %242 = vmatprep.subr.bf16.mxu1 %v273_v3  ;;  %v100_v10 = vld [vmem:[%s332_s2] sm:$0xff]  ;;  %s183_s27 = sshll.u32 %s276_s26, 4  ;;  %s184_s27 = int_to_ptr.vmem [resolvable:$true] %s183_s27 }
   0x6   :  { %s249_s0 = scalar_lea.vmem %s184_s27, 128  ;;  %p254_p1 = scmp.lt.s32.totalorder %s184_s27, %s184_s27 }
   0x7   :  { %p250_p0 = scmp.ne.s32.totalorder %s184_s27, %s249_s0  ;;  %p255_p2 = scmp.lt.s32.totalorder %s249_s0, %s249_s0 }
   0x8   :  { %238 = vmatpush3.bf16.msra.mxu0 %v237_v7  ;;  %244 = vmatpush3.bf16.msra.mxu1 %v237_v7 }
   0x9   :  { %215 = vmatprep.subr.mxu0 %v275_v6  ;;  %228 = vmatprep.subr.mxu1 %v275_v6  ;;  %p256_p3 = por %p255_p2, %p254_p1 }
   0xb   :  { %p257_p4 = pnand %p256_p3, %p250_p0 }
   0xc   :  { %216 = vmatpush3.msk.msra.mxu0 %vm25_vm1, %v19_v8  ;;  %229 = vmatpush3.msk.msra.mxu1 %vm25_vm1, %v19_v8 }
   0xd   :  { %218 = vmatmul.mubr.msk.f32.vlgmr.msra.gmra.mrb[0].mxu0 %vm21_vm2, %v20_v9  ;;  %231 = vmatmul.mubr.msk.f32.vlgmr.msra.gmra.mrb[0].mxu1 %vm21_vm2, %v100_v10 }
  0xe0   :  { %v95_v11 = vpop.f32.mrb[0].mxu0  ;;  %v170_v12 = vpop.f32.mrb[0].mxu1 }
  0xe1   :  { %v99_v13 = vmax.f32 %v95_v11, 0.0  ;;  %v174_v14 = vmax.f32 %v170_v12, 0.0  ;;  %v219_v15 = vpop.f32.mrb[1].mxu0  ;;  %v232_v16 = vpop.f32.mrb[1].mxu1 }
  0xe3   :  { %v175_v17 = vadd.f32 %v174_v14, %v99_v13 }
  0xe5   :  { %176 = vst [vmem:[#allocation2] sm:$0xff] %v175_v17 }
  0xe6   :  { %260 = shalt.err (!%p257_p4)
}
  0xe7   :  { %s261_s28 = scalar_lea.hbm %s333_s3, 128 }
  0xe8   :  { %p262_p5 = scmp.ne.s32.totalorder %s333_s3, %s261_s28  ;;  %p265_p6 = scmp.lt.u32.totalorder %s261_s28, %s333_s3 }
  0xea   :  { %p267_p7 = pnand %p265_p6, %p262_p5 }
  0xec   :  { %270 = shalt.err (!%p267_p7)
}
  0xed   :  { %186 = dma.vmem_to_hbm [thread:$0]  %s184_s27, 128, %s333_s3, [#allocation3]  }
  0xee   :  { %271 = dma.done.wait [#allocation3], 128  }
  0xef   :  { %272 = vsyncadd [#allocation3], 4294967168 }
  0xf0   :  { %190 = vsyncpa [#allocation3], 1 }

</bundles_post_ra>
